<compile_context>
chip_gen: v6e
topology: v6e:2x2x1
jax: 0.10.0
libtpu: 0.0.40
codegen_flags: <defaults>
</compile_context>

<pallas_src>
import jax
import jax.numpy as jnp
from jax.experimental import pallas as pl
from jax.experimental.pallas import tpu as pltpu

BASIS_DEGREE = 6


def _linear_kernel(x_ref, w_ref, b_ref, o_ref):
    # x_ref: (6, TB) VMEM   w_ref: (6,) SMEM   b_ref: (1,) SMEM   o_ref: (1, TB) VMEM
    # y[b] = sum_k x[k, b] * w[k] + bias   -- pure VPU streaming, no MXU.
    acc = x_ref[0:1, :] * w_ref[0]
    for k in range(1, BASIS_DEGREE):           # static unroll, 6 fused mul-adds
        acc = acc + x_ref[k:k + 1, :] * w_ref[k]
    o_ref[...] = (acc + b_ref[0]).astype(o_ref.dtype)


def net_forward(x, w, b, *, block_b=4096):
    """Forward pass of Net.

    x: (B, BASIS_DEGREE) float32
    w: weights with BASIS_DEGREE elements (any shape, e.g. (6,), (6,1) or (1,6))
    b: bias with 1 element
    returns: (B, 1) float32
    """
    B = x.shape[0]
    x = x.astype(jnp.float32)
    w = jnp.asarray(w, jnp.float32).reshape(BASIS_DEGREE)
    b = jnp.asarray(b, jnp.float32).reshape(1)

    # Lane-aligned batch block: multiple of 128, capped at block_b.
    tb = min(block_b, pl.cdiv(B, 128) * 128)
    b_pad = pl.cdiv(B, tb) * tb

    # Layout plumbing in the wrapper (cheap XLA transpose/pad): batch -> lanes.
    x_t = jnp.pad(x, ((0, b_pad - B), (0, 0))).T          # (6, b_pad)

    out = pl.pallas_call(
        _linear_kernel,
        out_shape=jax.ShapeDtypeStruct((1, b_pad), jnp.float32),
        grid=(b_pad // tb,),
        in_specs=[
            pl.BlockSpec((BASIS_DEGREE, tb), lambda i: (0, i)),      # activations
            pl.BlockSpec(memory_space=pltpu.MemorySpace.SMEM),       # weights (scalars)
            pl.BlockSpec(memory_space=pltpu.MemorySpace.SMEM),       # bias   (scalar)
        ],
        out_specs=pl.BlockSpec((1, tb), lambda i: (0, i)),
        compiler_params=pltpu.CompilerParams(
            dimension_semantics=("parallel",),
        ),
    )(x_t, w, b)

    return out[0, :B].reshape(B, 1)


def init_params(key):
    """Matches nn.Linear(BASIS_DEGREE, 1) default init; weight kept as (6,), bias (1,)."""
    kw, kb = jax.random.split(key)
    bound = 1.0 / jnp.sqrt(jnp.float32(BASIS_DEGREE))
    w = jax.random.uniform(kw, (BASIS_DEGREE,), jnp.float32, -bound, bound)
    b = jax.random.uniform(kb, (1,), jnp.float32, -bound, bound)
    return w, b


if __name__ == "__main__":
    key = jax.random.PRNGKey(0)
    kx, kp, kx2 = jax.random.split(key, 3)
    w, b = init_params(kp)

    # Small demo batch (single grid step after lane padding).
    B = 8
    x = jax.random.normal(kx, (B, BASIS_DEGREE), jnp.float32)
    out = net_forward(x, w, b)
    jax.block_until_ready(out)
    ref = x @ w.reshape(BASIS_DEGREE, 1) + b
    assert out.shape == (B, 1)
    assert jnp.allclose(out, ref, atol=1e-5, rtol=1e-5), "mismatch vs reference (B=8)"

    # Unaligned batch exercising multiple grid steps + padding path.
    B2 = 300
    x2 = jax.random.normal(kx2, (B2, BASIS_DEGREE), jnp.float32)
    out2 = net_forward(x2, w, b, block_b=128)   # tb=128 -> grid=(3,)
    jax.block_until_ready(out2)
    ref2 = x2 @ w.reshape(BASIS_DEGREE, 1) + b
    assert out2.shape == (B2, 1)
    assert jnp.allclose(out2, ref2, atol=1e-5, rtol=1e-5), "mismatch vs reference (B=300)"

    print("KERNEL_OK")
</pallas_src>

<mosaic_0001>
module attributes {stable_mosaic.version = 11 : i64} {
  func.func @_linear_kernel(%arg0: i32, %arg1: memref<6x128xf32, #tpu.memory_space<vmem>>, %arg2: memref<6xf32, #tpu.memory_space<smem>>, %arg3: memref<1xf32, #tpu.memory_space<smem>>, %arg4: memref<1x128xf32, #tpu.memory_space<vmem>>) attributes {dimension_semantics = [#tpu.dimension_semantics<parallel>], iteration_bounds = array<i64: 1>, scalar_prefetch = 0 : i64, scratch_operands = 0 : i64, tpu.core_type = #tpu.core_type<tc>, window_params = [{transform_indices = @transform_0, window_bounds = array<i64: 6, 128>}, {transform_indices = @transform_1, window_bounds = array<i64: 6>}, {transform_indices = @transform_2, window_bounds = array<i64: 1>}, {transform_indices = @transform_3, window_bounds = array<i64: 1, 128>}]} {
    %c0 = arith.constant 0 : index
    %c0_0 = arith.constant 0 : index
    %0 = vector.load %arg1[%c0, %c0_0] : memref<6x128xf32, #tpu.memory_space<vmem>>, vector<1x128xf32>
    %c0_1 = arith.constant 0 : index
    %1 = memref.load %arg2[%c0_1] : memref<6xf32, #tpu.memory_space<smem>>
    %2 = vector.broadcast %1 : f32 to vector<1x128xf32>
    %3 = arith.mulf %0, %2 : vector<1x128xf32>
    %c1 = arith.constant 1 : index
    %c0_2 = arith.constant 0 : index
    %4 = vector.load %arg1[%c1, %c0_2] : memref<6x128xf32, #tpu.memory_space<vmem>>, vector<1x128xf32>
    %c1_3 = arith.constant 1 : index
    %5 = memref.load %arg2[%c1_3] : memref<6xf32, #tpu.memory_space<smem>>
    %6 = vector.broadcast %5 : f32 to vector<1x128xf32>
    %7 = arith.mulf %4, %6 : vector<1x128xf32>
    %8 = arith.addf %3, %7 : vector<1x128xf32>
    %c2 = arith.constant 2 : index
    %c0_4 = arith.constant 0 : index
    %9 = vector.load %arg1[%c2, %c0_4] : memref<6x128xf32, #tpu.memory_space<vmem>>, vector<1x128xf32>
    %c2_5 = arith.constant 2 : index
    %10 = memref.load %arg2[%c2_5] : memref<6xf32, #tpu.memory_space<smem>>
    %11 = vector.broadcast %10 : f32 to vector<1x128xf32>
    %12 = arith.mulf %9, %11 : vector<1x128xf32>
    %13 = arith.addf %8, %12 : vector<1x128xf32>
    %c3 = arith.constant 3 : index
    %c0_6 = arith.constant 0 : index
    %14 = vector.load %arg1[%c3, %c0_6] : memref<6x128xf32, #tpu.memory_space<vmem>>, vector<1x128xf32>
    %c3_7 = arith.constant 3 : index
    %15 = memref.load %arg2[%c3_7] : memref<6xf32, #tpu.memory_space<smem>>
    %16 = vector.broadcast %15 : f32 to vector<1x128xf32>
    %17 = arith.mulf %14, %16 : vector<1x128xf32>
    %18 = arith.addf %13, %17 : vector<1x128xf32>
    %c4 = arith.constant 4 : index
    %c0_8 = arith.constant 0 : index
    %19 = vector.load %arg1[%c4, %c0_8] : memref<6x128xf32, #tpu.memory_space<vmem>>, vector<1x128xf32>
    %c4_9 = arith.constant 4 : index
    %20 = memref.load %arg2[%c4_9] : memref<6xf32, #tpu.memory_space<smem>>
    %21 = vector.broadcast %20 : f32 to vector<1x128xf32>
    %22 = arith.mulf %19, %21 : vector<1x128xf32>
    %23 = arith.addf %18, %22 : vector<1x128xf32>
    %c5 = arith.constant 5 : index
    %c0_10 = arith.constant 0 : index
    %24 = vector.load %arg1[%c5, %c0_10] : memref<6x128xf32, #tpu.memory_space<vmem>>, vector<1x128xf32>
    %c5_11 = arith.constant 5 : index
    %25 = memref.load %arg2[%c5_11] : memref<6xf32, #tpu.memory_space<smem>>
    %26 = vector.broadcast %25 : f32 to vector<1x128xf32>
    %27 = arith.mulf %24, %26 : vector<1x128xf32>
    %28 = arith.addf %23, %27 : vector<1x128xf32>
    %c0_12 = arith.constant 0 : index
    %29 = memref.load %arg3[%c0_12] : memref<1xf32, #tpu.memory_space<smem>>
    %30 = vector.broadcast %29 : f32 to vector<1x128xf32>
    %31 = arith.addf %28, %30 : vector<1x128xf32>
    %c0_13 = arith.constant 0 : index
    %c0_14 = arith.constant 0 : index
    %32 = vector.load %arg4[%c0_13, %c0_14] : memref<1x128xf32, #tpu.memory_space<vmem>>, vector<1x128xf32>
    tpu.vector_store %arg4[%c0_13, %c0_14], %31 {strides = array<i32>} : memref<1x128xf32, #tpu.memory_space<vmem>>, vector<1x128xf32>,
    return
  }
  func.func @transform_0(%arg0: i32) -> (i32, i32) {
    %c0_i32 = arith.constant 0 : i32
    %c0_i32_0 = arith.constant 0 : i32
    return %c0_i32, %arg0 : i32, i32
  }
  func.func @transform_1(%arg0: i32) -> i32 {
    %c0_i32 = arith.constant 0 : i32
    %c0_i32_0 = arith.constant 0 : i32
    return %c0_i32 : i32
  }
  func.func @transform_2(%arg0: i32) -> i32 {
    %c0_i32 = arith.constant 0 : i32
    %c0_i32_0 = arith.constant 0 : i32
    return %c0_i32 : i32
  }
  func.func @transform_3(%arg0: i32) -> (i32, i32) {
    %c0_i32 = arith.constant 0 : i32
    %c0_i32_0 = arith.constant 0 : i32
    return %c0_i32, %arg0 : i32, i32
  }
}

</mosaic_0001>

<bundles_post_ra>
// kernel: tpu_custom_call.1
= control target key start
LH: loop header
LB: loop body
LE: loop exit
PB: predicated region body
PF: predicated region fallthrough
CT: control target
= control target key end

     0   :  { %9 = vsyncpa [#allocation4], 0  ;;  %s191_s0 = inlined_call_operand.hbm [shape: f32[6,128], index: 0, kind: input, shape index: {}]   ;;  %s192_s1 = inlined_call_operand.vmem [shape: f32[6], index: 1, kind: input, shape index: {}]   ;;  %s193_s2 = inlined_call_operand.<no memory space> [shape: f32[1], index: 2, kind: input, shape index: {}]   ;;  %s194_s3 = inlined_call_operand.hbm [shape: f32[1,128], index: 3, kind: output, shape index: {}]  }
   0x1   :  { %10 = vsyncpa [#allocation6], 0 }
   0x2   :  { %11 = vsyncpa [#allocation5], 0  ;;  %s28_s14 = sshll.u32 %s192_s1, 4  ;;  %s156_s15 = smov [#allocation3]   ;;  %s29_s14 = int_to_ptr.vmem [resolvable:$true] %s28_s14 }
   0x3   :  { %s18_s16 = sshll.u32 %s156_s15, 4  ;;  %s19_s16 = int_to_ptr.vmem [resolvable:$true] %s18_s16 }
   0x4   :  { %s106_s17 = scalar_lea.vmem %s19_s16, 128  ;;  %p111_p1 = scmp.lt.s32.totalorder %s19_s16, %s19_s16 }
   0x5   :  { %p107_p0 = scmp.ne.s32.totalorder %s19_s16, %s106_s17  ;;  %p112_p2 = scmp.lt.s32.totalorder %s106_s17, %s106_s17 }
   0x7   :  { %p113_p3 = por %p112_p2, %p111_p1 }
   0x9   :  { %p114_p4 = pnand %p113_p3, %p107_p0 }
   0xb   :  { %117 = shalt.err (!%p114_p4)
}
   0xc   :  { %21 = dma.hbm_to_vmem [thread:$0]  %s191_s0, 128, %s19_s16, [#allocation4]  }
   0xd   :  { %s118_s20 = scalar_lea.vmem %s29_s14, 16  ;;  %p123_p6 = scmp.lt.s32.totalorder %s29_s14, %s29_s14 }
   0xe   :  { %p119_p5 = scmp.ne.s32.totalorder %s29_s14, %s118_s20  ;;  %p124_p7 = scmp.lt.s32.totalorder %s118_s20, %s118_s20 }
  0x10   :  { %p125_p8 = por %p124_p7, %p123_p6 }
  0x12   :  { %p126_p9 = pnand %p125_p8, %p119_p5 }
  0x14   :  { %129 = shalt.err (!%p126_p9)
}
  0x15   :  { %s157_s1 = smov [#allocation7]  }
  0x16   :  { %31 = dma.vmem_to_smem %s29_s14, 16, %s157_s1, [#allocation6]  }
  0x17   :  { %150 = dma.done.wait [#allocation4], 128  }
  0x18   :  { %151 = vsyncadd [#allocation4], 4294967168 }
  0x19   :  { %152 = dma.done.wait [#allocation6], 16  }
  0x1a   :  { %153 = vsyncadd [#allocation6], 4294967280 }
  0x1b   :  { %40 = sfence }
  0x1c   :  { %s42_s21 = sld [smem:[#allocation7]]  ;;  %v41_v0 = vld [vmem:[#allocation3] sm:$0x1]  ;;  %v45_v1 = vld [vmem:[#allocation3 + $0x1] sm:$0x1]  ;;  %v71_v22 = vstv %s193_s2  ;;  %s158_s28 = smov [#allocation8]  }
  0x1d   :  { %s90_s22 = sld [smem:[#allocation7 + $0x1]]  ;;  %v50_v3 = vld [vmem:[#allocation3 + $0x2] sm:$0x1]  ;;  %v55_v6 = vld [vmem:[#allocation3 + $0x3] sm:$0x1]  ;;  %s80_s29 = sshll.u32 %s158_s28, 4  ;;  %s81_s29 = int_to_ptr.vmem [resolvable:$true] %s80_s29 }
  0x1e   :  { %s91_s23 = sld [smem:[#allocation7 + $0x2]]  ;;  %v60_v11 = vld [vmem:[#allocation3 + $0x4] sm:$0x1]  ;;  %v65_v15 = vld [vmem:[#allocation3 + $0x5] sm:$0x1]  ;;  %s130_s30 = scalar_lea.vmem %s81_s29, 16 }
  0x1f   :  { %s92_s24 = sld [smem:[#allocation7 + $0x3]]  ;;  %p131_p10 = scmp.ne.s32.totalorder %s81_s29, %s130_s30 }
  0x20   :  { %s93_s0 = sld [smem:[#allocation7 + $0x4]]  ;;  %s134_s4 = scalar_lea.vmem %s81_s29, 32 }
  0x21   :  { %s94_s25 = sld [smem:[#allocation7 + $0x5]]  ;;  %p135_p11 = scmp.lt.s32.totalorder %s81_s29, %s81_s29 }
  0x22   :  { %v43_v2 = vstv %s42_s21  ;;  %p136_p12 = scmp.lt.s32.totalorder %s134_s4, %s130_s30 }
  0x23   :  { %v44_v4 = vmul.f32 %v43_v2, %v41_v0  ;;  %v47_v5 = vstv %s90_s22 }
  0x24   :  { %v48_v7 = vmul.f32 %v47_v5, %v45_v1  ;;  %v52_v8 = vstv %s91_s23  ;;  %p137_p13 = por %p136_p12, %p135_p11 }
  0x25   :  { %v53_v9 = vmul.f32 %v52_v8, %v50_v3  ;;  %v57_v10 = vstv %s92_s24 }
  0x26   :  { %v49_v12 = vadd.f32 %v48_v7, %v44_v4  ;;  %v58_v13 = vmul.f32 %v57_v10, %v55_v6  ;;  %v62_v14 = vstv %s93_s0  ;;  %p138_p0 = pnand %p137_p13, %p131_p10 }
  0x27   :  { %v67_v16 = vstv %s94_s25  ;;  %v63_v18 = vmul.f32 %v62_v14, %v60_v11 }
  0x28   :  { %v54_v17 = vadd.f32 %v53_v9, %v49_v12  ;;  %v68_v20 = vmul.f32 %v67_v16, %v65_v15 }
  0x2a   :  { %v59_v19 = vadd.f32 %v58_v13, %v54_v17 }
  0x2c   :  { %v64_v21 = vadd.f32 %v63_v18, %v59_v19 }
  0x2e   :  { %v69_v23 = vadd.f32 %v68_v20, %v64_v21 }
  0x30   :  { %v72_v24 = vadd.f32 %v71_v22, %v69_v23 }
  0x32   :  { %73 = vst [vmem:[#allocation8] sm:$0x1] %v72_v24 }
  0x33   :  { %141 = shalt.err (!%p138_p0)
}
  0x34   :  { %83 = dma.vmem_to_hbm [thread:$0]  %s81_s29, 16, %s194_s3, [#allocation5]  }
  0x35   :  { %154 = dma.done.wait [#allocation5], 16  }
  0x36   :  { %155 = vsyncadd [#allocation5], 4294967280 }
  0x37   :  { %87 = vsyncpa [#allocation4], 1 }
  0x38   :  { %88 = vsyncpa [#allocation5], 1 }
  0x39   :  { %89 = vsyncpa [#allocation6], 1 }

</bundles_post_ra>
